<compile_context>
chip_gen: v5e
topology: v5e:2x2
jax: 0.10.0
libtpu: 0.0.40
codegen_flags: <defaults>
</compile_context>

<pallas_src>
import math

import jax
import jax.numpy as jnp
from jax.experimental import pallas as pl
from jax.experimental.pallas import tpu as pltpu


def make_positional_encoding(input_channels: int,
                             tensor_len: int = 5000,
                             dtype=jnp.float32) -> jnp.ndarray:
    """Replicates the PyTorch buffer construction; the forward only ever uses
    the squeezed (tensor_len, C) view, so we build that directly.  Build it in
    the model's compute dtype to enable the zero-copy pe path below."""
    position = jnp.arange(0, tensor_len, dtype=jnp.float32)[:, None]          # (L, 1)
    div_term = jnp.exp(
        jnp.arange(0, input_channels, 2, dtype=jnp.float32)
        * (-math.log(10000.0) / input_channels)
    )                                                                           # (ceil(C/2),)
    angles = position * div_term                                                # (L, ceil(C/2))
    pe = jnp.zeros((tensor_len, input_channels), dtype=jnp.float32)
    pe = pe.at[:, 0::2].set(jnp.sin(angles))
    # Slice cos() to the number of odd columns: bit-identical to PyTorch for
    # even C, and avoids the shape-mismatch latent bug for odd C.
    pe = pe.at[:, 1::2].set(jnp.cos(angles)[:, : input_channels // 2])
    return pe.astype(dtype)


def _pos_embed_kernel(x_ref, pe_ref, o_ref):
    # x_ref / o_ref: (TB, TF) tile of the flattened (B, S*C) array.
    # pe_ref:        (1, TF) tile, broadcast over the sublane (batch) axis.
    o_ref[...] = (x_ref[...] + pe_ref[...]).astype(o_ref.dtype)


# Budgets safe + near-roofline on all of v5e / v6e / v7x:
#  * 8 MiB x/out blocks: read+write of one block is ~5 us even at v7x's
#    3.2 TB/s HBM, so the fixed ~0.35 us grid-step overhead drops to ~5%
#    (vs ~20-25% at 2 MiB blocks).  v5e/v6e hit their ~86% roofline plateau
#    well before this size, so larger blocks buy nothing further there.
#  * 48 MiB scoped VMEM: 2x(in) + 2x(out) 8 MiB buffers + double-buffered pe
#    tile ~= 34 MiB, leaving >= 14 MiB headroom under v7x's 64 MiB physical.
_TARGET_BLOCK_BYTES = 8 * 1024 * 1024
_VMEM_LIMIT_BYTES = 48 * 1024 * 1024
_MEGACORE_SPLIT_MIN_BYTES = 512 * 1024   # only split a single-block problem above this


def position_embedding_forward(x: jnp.ndarray, pe_full: jnp.ndarray) -> jnp.ndarray:
    """x: (B, S, C); pe_full: (tensor_len, C). Returns x + pe_full[:S] (in x.dtype)."""
    B, S, C = x.shape
    L, Cpe = pe_full.shape
    if S > L:
        raise ValueError(f"sequence length {S} exceeds positional table length {L}")
    if Cpe != C:
        raise ValueError(f"channel mismatch: x has C={C}, pe table has C={Cpe}")

    # Lane-dense flattening: the kernel tiles' last dim is S*C, not C.
    F = S * C
    x2 = x.reshape(B, F)                         # free bitcast for row-major layout

    itemsize = jnp.dtype(x.dtype).itemsize
    # Sublane quantum: sub-32-bit dtypes pack 2/4 rows per sublane; keep TB a
    # multiple of the packed-row count so the store path stays fully dense.
    sub = {1: 32, 2: 16}.get(itemsize, 8)

    # ---- lane (flattened S*C) tile -----------------------------------------
    min_tb = min(B, sub)
    lane_budget = max(128, (_TARGET_BLOCK_BYTES // (min_tb * itemsize)) // 128 * 128)
    if F <= lane_budget:
        TF = F                          # whole flattened row per block (full-dim: legal)
    else:
        TF = lane_budget                # multiple of 128; ragged tail masked by Pallas

    # ---- batch (sublane) tile, derived from the byte budget ------------------
    rows_fit = max(1, _TARGET_BLOCK_BYTES // (TF * itemsize))
    if rows_fit >= B:
        TB = B                          # full-dim block: always legal, no ragged tail
    else:
        TB = (rows_fit // sub) * sub    # multiple of sub (>= 8): legal + dense
        if TB == 0:                     # defensive; cannot trigger at 8 MiB targets
            TB = min(B, 8)

    # ---- give v7x's second TensorCore a block to stream ----------------------
    # If the whole problem is one block, halve one parallel axis (no-op cost on
    # 1-TC v5e/v6e beyond one extra ~0.35 us grid step).
    if (pl.cdiv(F, TF) == 1 and pl.cdiv(B, TB) == 1
            and B * F * itemsize >= _MEGACORE_SPLIT_MIN_BYTES):
        half_tb = (TB // 2 // sub) * sub
        if half_tb >= 8:
            TB = half_tb                              # multiple of 8: legal
        elif TF >= 256:
            TF = ((TF // 2 + 127) // 128) * 128       # multiple of 128: legal

    nf = pl.cdiv(F, TF)
    nb = pl.cdiv(B, TB)

    # ---- pe operand: avoid the per-call slice + cast where possible ----------
    if pe_full.dtype == x.dtype and TF % 128 == 0:
        # Zero-copy path: flat view of the full table (free bitcast, no HBM
        # round trip).  The shared f index map only touches the first ~F
        # elements; any OOB read on a ragged last tile is padded and the
        # corresponding output lanes are masked (same as for x).
        pe2 = pe_full.reshape(1, L * C)
    else:
        # Awkward widths (TF == F, F % 128 != 0) or dtype mismatch: materialise
        # the exact (1, F) slab so the full-dim pe block stays legal, and any
        # cast only touches S*C elements.
        pe2 = pe_full[:S, :].astype(x.dtype).reshape(1, F)

    out2 = pl.pallas_call(
        _pos_embed_kernel,
        out_shape=jax.ShapeDtypeStruct((B, F), x.dtype),
        grid_spec=pltpu.PrefetchScalarGridSpec(
            num_scalar_prefetch=0,
            # F outermost, B innermost: pe's block index is constant across the
            # inner axis, so each pe tile is DMA'd once and stays VMEM-resident.
            grid=(nf, nb),
            in_specs=[
                pl.BlockSpec((TB, TF), lambda f, b: (b, f)),   # x tile
                pl.BlockSpec((1, TF), lambda f, b: (0, f)),    # pe tile (b-invariant)
            ],
            out_specs=pl.BlockSpec((TB, TF), lambda f, b: (b, f)),
        ),
        compiler_params=pltpu.CompilerParams(
            dimension_semantics=("parallel", "parallel"),
            vmem_limit_bytes=_VMEM_LIMIT_BYTES,
        ),
        # Optional: input_output_aliases={0: 0} + donated x would drop the
        # extra output allocation; left off since it needs donation upstream.
    )(x2, pe2)

    return out2.reshape(B, S, C)


if __name__ == "__main__":
    # --- check 1: tiny shape from the module spec (f32, lane-aligned F) ------
    B, S, C = 2, 8, 32
    x = jax.random.normal(jax.random.PRNGKey(0), (B, S, C), dtype=jnp.float32)
    pe_full = make_positional_encoding(C, tensor_len=64)
    out = jax.block_until_ready(position_embedding_forward(x, pe_full))
    ref = x + pe_full[:S, :][None, :, :]
    assert out.shape == (B, S, C)
    assert jnp.allclose(out, ref, atol=1e-6), "mismatch vs reference (base case)"

    # --- check 2: non-128-multiple flattened width (sliced-pe, full-dim tile) -
    B2, S2, C2 = 3, 10, 20
    x_b = jax.random.normal(jax.random.PRNGKey(0), (B2, S2, C2), dtype=jnp.float32)
    pe_full2 = make_positional_encoding(C2, tensor_len=32)
    out_b = jax.block_until_ready(position_embedding_forward(x_b, pe_full2))
    ref_b = x_b + pe_full2[:S2, :][None, :, :]
    assert jnp.allclose(out_b, ref_b, atol=1e-6), "mismatch vs reference (ragged width)"

    # --- check 3: mid-size shape that triggers the megacore (2-block) split ---
    B3, S3, C3 = 2, 512, 128
    x_c = jax.random.normal(jax.random.PRNGKey(0), (B3, S3, C3), dtype=jnp.float32)
    pe_full3 = make_positional_encoding(C3, tensor_len=1024)
    out_c = jax.block_until_ready(position_embedding_forward(x_c, pe_full3))
    ref_c = x_c + pe_full3[:S3, :][None, :, :]
    assert jnp.allclose(out_c, ref_c, atol=1e-6), "mismatch vs reference (split grid)"

    # --- check 4: bf16 input + bf16 pe table (zero-copy pe, packed sublanes) --
    B4, S4, C4 = 4, 16, 64
    x_d = jax.random.normal(jax.random.PRNGKey(0), (B4, S4, C4), dtype=jnp.bfloat16)
    pe_full4 = make_positional_encoding(C4, tensor_len=32, dtype=jnp.bfloat16)
    out_d = jax.block_until_ready(position_embedding_forward(x_d, pe_full4))
    ref_d = x_d + pe_full4[:S4, :][None, :, :]
    assert jnp.allclose(out_d.astype(jnp.float32), ref_d.astype(jnp.float32),
                        atol=1e-2), "mismatch vs reference (bf16)"

    print("KERNEL_OK")
</pallas_src>

<mosaic_0001>
module attributes {stable_mosaic.version = 11 : i64} {
  func.func @_pos_embed_kernel(%arg0: i32, %arg1: i32, %arg2: memref<2x256xf32, #tpu.memory_space<vmem>>, %arg3: memref<1x256xf32, #tpu.memory_space<vmem>>, %arg4: memref<2x256xf32, #tpu.memory_space<vmem>>) attributes {dimension_semantics = [#tpu.dimension_semantics<parallel>, #tpu.dimension_semantics<parallel>], iteration_bounds = array<i64: 1, 1>, scalar_prefetch = 0 : i64, scratch_operands = 0 : i64, tpu.core_type = #tpu.core_type<tc>, window_params = [{transform_indices = @transform_0, window_bounds = array<i64: 2, 256>}, {transform_indices = @transform_1, window_bounds = array<i64: 1, 256>}, {transform_indices = @transform_2, window_bounds = array<i64: 2, 256>}]} {
    %c0 = arith.constant 0 : index
    %c0_0 = arith.constant 0 : index
    %0 = vector.load %arg2[%c0, %c0_0] : memref<2x256xf32, #tpu.memory_space<vmem>>, vector<2x256xf32>
    %c0_1 = arith.constant 0 : index
    %c0_2 = arith.constant 0 : index
    %1 = vector.load %arg3[%c0_1, %c0_2] : memref<1x256xf32, #tpu.memory_space<vmem>>, vector<1x256xf32>
    %2 = vector.broadcast %1 : vector<1x256xf32> to vector<2x256xf32>
    %3 = arith.addf %0, %2 : vector<2x256xf32>
    %c0_3 = arith.constant 0 : index
    %c0_4 = arith.constant 0 : index
    %4 = vector.load %arg4[%c0_3, %c0_4] : memref<2x256xf32, #tpu.memory_space<vmem>>, vector<2x256xf32>
    tpu.vector_store %arg4[%c0_3, %c0_4], %3 {strides = array<i32>} : memref<2x256xf32, #tpu.memory_space<vmem>>, vector<2x256xf32>,
    return
  }
  func.func @transform_0(%arg0: i32, %arg1: i32) -> (i32, i32) {
    %c0_i32 = arith.constant 0 : i32
    return %arg1, %arg0 : i32, i32
  }
  func.func @transform_1(%arg0: i32, %arg1: i32) -> (i32, i32) {
    %c0_i32 = arith.constant 0 : i32
    %c0_i32_0 = arith.constant 0 : i32
    return %c0_i32, %arg0 : i32, i32
  }
  func.func @transform_2(%arg0: i32, %arg1: i32) -> (i32, i32) {
    %c0_i32 = arith.constant 0 : i32
    return %arg1, %arg0 : i32, i32
  }
}

</mosaic_0001>

<bundles_post_ra>
// kernel: tpu_custom_call.1
= control target key start
LH: loop header
LB: loop body
LE: loop exit
PB: predicated region body
PF: predicated region fallthrough
CT: control target
= control target key end

     0   :  { %7 = vsyncpa [#allocation3], 0  ;;  %s177_s0 = inlined_call_operand.hbm [shape: f32[2,256], index: 0, kind: input, shape index: {}]   ;;  %s178_s1 = inlined_call_operand.hbm [shape: f32[1,2048], index: 1, kind: input, shape index: {}]   ;;  %s179_s2 = inlined_call_operand.hbm [shape: f32[2,256], index: 2, kind: output, shape index: {}]  }
   0x1   :  { %8 = vsyncpa [#allocation6], 0 }
   0x2   :  { %9 = vsyncpa [#allocation4], 0  ;;  %s15_s11 = sshll.u32 %s177_s0, 4  ;;  %s150_s12 = smov [#allocation2]   ;;  %s16_s11 = int_to_ptr.hbm [resolvable:$true] %s15_s11 }
   0x3   :  { %s17_s13 = sshll.u32 %s150_s12, 4  ;;  %s26_s16 = sshll.u32 %s178_s1, 4  ;;  %s18_s13 = int_to_ptr.vmem [resolvable:$true] %s17_s13  ;;  %s27_s16 = int_to_ptr.hbm [resolvable:$true] %s26_s16 }
   0x4   :  { %20 = dma.hbm_to_vmem [thread:$0]  %s16_s11, 64, %s18_s13, [#allocation3]  }
   0x5   :  { %s151_s17 = smov [#allocation5]  }
   0x6   :  { %s28_s18 = sshll.u32 %s151_s17, 4  ;;  %s29_s18 = int_to_ptr.vmem [resolvable:$true] %s28_s18 }
   0x7   :  { %31 = dma.hbm_to_vmem [thread:$0]  %s27_s16, 32, %s29_s18, [#allocation6]  }
   0x8   :  { %144 = dma.done.wait [#allocation3], 64  }
   0x9   :  { %145 = vsyncadd [#allocation3], 4294967232 }
   0xa   :  { %146 = dma.done.wait [#allocation6], 32  }
   0xb   :  { %147 = vsyncadd [#allocation6], 4294967264  ;;  %v41_v0 = vld [vmem:[#allocation5] sm:$0x3]  ;;  %vm46_vm0 = vcmask 1041408   ;;  %s152_s0 = smov [#allocation7]  }
   0xc   :  { %v43_v1 = vperm.slane %v41_v0, 0  ;;  %v44_v2 = vperm.slane %v41_v0, 1  ;;  %v40_v3 = vld [vmem:[#allocation2] sm:$0xf]  ;;  %s56_s19 = sshll.u32 %s152_s0, 4  ;;  %s58_s21 = sshll.u32 %s179_s2, 4  ;;  %s57_s19 = int_to_ptr.vmem [resolvable:$true] %s56_s19  ;;  %s59_s21 = int_to_ptr.hbm [resolvable:$true] %s58_s21 }
   0xe   :  { %v45_v4 = vrot.slane %v44_v2, 6 }
  0x10   :  { %v47_v5 = vsel %vm46_vm0, %v43_v1, %v45_v4 }
  0x11   :  { %v49_v6 = vadd.f32 %v47_v5, %v40_v3 }
  0x13   :  { %50 = vst [vmem:[#allocation7] sm:$0xf] %v49_v6 }
  0x14   :  { %61 = dma.vmem_to_hbm [thread:$0]  %s57_s19, 64, %s59_s21, [#allocation4]  }
  0x15   :  { %148 = dma.done.wait [#allocation4], 64  }
  0x16   :  { %149 = vsyncadd [#allocation4], 4294967232 }
  0x17   :  { %66 = vsyncpa [#allocation3], 1 }
  0x18   :  { %67 = vsyncpa [#allocation6], 1 }
  0x19   :  { %68 = vsyncpa [#allocation4], 1 }

</bundles_post_ra>
